<compile_context>
chip_gen: v5e
topology: v5e:2x2
jax: 0.10.0
libtpu: 0.0.40
codegen_flags: <defaults>
</compile_context>

<pallas_src>
import functools

import jax
import jax.numpy as jnp
from jax import lax
from jax.experimental import pallas as pl
from jax.experimental.pallas import tpu as pltpu


def _round_up(x: int, m: int) -> int:
    return (x + m - 1) // m * m


def _softmax_loss_kernel(tgt_ref, x_ref, out_ref, m_ref, l_ref, p_ref, *, B, V, TB, TV):
    """Grid = (batch tiles, vocab tiles); vocab is the reduction axis (last).

    tgt_ref: (TB, 1)  int32 target indices (VMEM)
    x_ref:   (TB, TV) logits block (any float dtype; upcast here)
    out_ref: (TB, 1)  f32 per-row log p(target)  (written at last vocab tile)
    m_ref/l_ref/p_ref: (TB, 1) f32 scratch — running max, running sum(exp),
                       accumulated target-column logit.
    """
    i = pl.program_id(0)   # batch-tile index
    k = pl.program_id(1)   # vocab-tile index (reduction)

    @pl.when(k == 0)
    def _init():
        m_ref[...] = jnp.full_like(m_ref, -jnp.inf)
        l_ref[...] = jnp.zeros_like(l_ref)
        p_ref[...] = jnp.zeros_like(p_ref)

    # Upcast per tile (bf16 inputs stream from HBM at half the bytes).
    x = x_ref[...].astype(jnp.float32)                               # (TB, TV)

    # Global row / col indices for padding masks.
    row = i * TB + lax.broadcasted_iota(jnp.int32, (TB, TV), 0)
    col = k * TV + lax.broadcasted_iota(jnp.int32, (TB, TV), 1)
    valid = (row < B) & (col < V)
    x = jnp.where(valid, x, -jnp.inf)                                # mask padding

    # Online log-sum-exp over the vocab tiles.
    m_prev = m_ref[...]                                              # (TB, 1)
    m_new = jnp.maximum(m_prev, jnp.max(x, axis=-1, keepdims=True))
    alpha = jnp.exp(m_prev - m_new)
    l_ref[...] = alpha * l_ref[...] + jnp.sum(jnp.exp(x - m_new), axis=-1, keepdims=True)
    m_ref[...] = m_new

    # Accumulate the target-column logit directly (no full logp tile).
    # TODO(synk): PyTorch NLLLoss errors on out-of-range targets; here they
    # silently contribute a picked logit of 0 (no clean in-kernel assert).
    tgt = tgt_ref[...]                                               # (TB, 1) int32
    hit = (col == tgt) & valid
    p_ref[...] += jnp.sum(jnp.where(hit, x, 0.0), axis=-1, keepdims=True)

    @pl.when(k == pl.num_programs(1) - 1)
    def _finalize():
        lse = jnp.log(l_ref[...]) + m_ref[...]                       # (TB, 1)
        logp_t = p_ref[...] - lse                                    # log p(target)
        row_ok = (i * TB + lax.broadcasted_iota(jnp.int32, (TB, 1), 0)) < B
        out_ref[...] = jnp.where(row_ok, logp_t, 0.0)


@functools.partial(jax.jit, static_argnames=("tb", "tv"))
def softmax_loss(pos_center: jax.Array, pos_context: jax.Array, *, tb: int = 256, tv: int = 2048) -> jax.Array:
    """Equivalent of SoftMaxLoss.forward({'pos_center': ..., 'pos_context': ...})."""
    B, V = pos_center.shape

    # Tile sizes: lane-dense, (8,128)-aligned, and well inside scoped VMEM on
    # v5e/v6e/v7x (256 x 2048 f32 block = 2 MiB, x2 double-buffering = 4 MiB).
    TB = min(tb, _round_up(B, 8))
    TV = min(tv, _round_up(V, 128))
    B_pad = _round_up(B, TB)
    V_pad = _round_up(V, TV)

    tgt = pos_context.reshape(B, 1).astype(jnp.int32)
    x = pos_center  # keep native dtype (no full-array HBM cast in the wrapper)
    if (B_pad, V_pad) != (B, V):       # only when shapes don't divide the tiles
        x = jnp.pad(x, ((0, B_pad - B), (0, V_pad - V)))
        tgt = jnp.pad(tgt, ((0, B_pad - B), (0, 0)))

    grid = (B_pad // TB, V_pad // TV)
    kernel = functools.partial(_softmax_loss_kernel, B=B, V=V, TB=TB, TV=TV)

    cost = pl.CostEstimate(
        flops=6 * B_pad * V_pad,
        transcendentals=B_pad * V_pad,
        bytes_accessed=B_pad * V_pad * x.dtype.itemsize + 2 * B_pad * 4,
    )

    per_row_logp = pl.pallas_call(
        kernel,
        out_shape=jax.ShapeDtypeStruct((B_pad, 1), jnp.float32),
        grid_spec=pltpu.PrefetchScalarGridSpec(
            num_scalar_prefetch=0,
            grid=grid,
            in_specs=[
                pl.BlockSpec((TB, 1), lambda i, k: (i, 0)),    # targets (block constant over k)
                pl.BlockSpec((TB, TV), lambda i, k: (i, k)),   # logits
            ],
            out_specs=pl.BlockSpec((TB, 1), lambda i, k: (i, 0)),
            scratch_shapes=[
                pltpu.VMEM((TB, 1), jnp.float32),   # running max
                pltpu.VMEM((TB, 1), jnp.float32),   # running sum(exp)
                pltpu.VMEM((TB, 1), jnp.float32),   # picked target logit
            ],
        ),
        compiler_params=pltpu.CompilerParams(
            dimension_semantics=("parallel", "arbitrary"),
            vmem_limit_bytes=64 * 1024 * 1024,
        ),
        cost_estimate=cost,
    )(tgt, x)

    # NLLLoss(reduction='mean'): -mean over the *true* batch rows.
    return -jnp.sum(per_row_logp) / jnp.float32(B)


def _reference(pos_center, pos_context):
    logp = jax.nn.log_softmax(pos_center.astype(jnp.float32), axis=-1)
    picked = jnp.take_along_axis(logp, pos_context[:, None].astype(jnp.int32), axis=-1)[:, 0]
    return -jnp.mean(picked)


if __name__ == "__main__":
    key = jax.random.PRNGKey(0)

    # Case 1: tile-aligned word2vec-style shapes (batch=8, vocab=128).
    B, V = 8, 128
    k1, k2, k3, k4 = jax.random.split(key, 4)
    pos_center = jax.random.normal(k1, (B, V), dtype=jnp.float32)       # logits
    pos_context = jax.random.randint(k2, (B,), 0, V, dtype=jnp.int32)   # targets

    loss = jax.block_until_ready(softmax_loss(pos_center, pos_context))
    ref = _reference(pos_center, pos_context)
    assert jnp.allclose(loss, ref, atol=1e-5, rtol=1e-5), (loss, ref)

    # Case 2: non-tile-aligned shapes exercise the padding/masking path.
    B2, V2 = 6, 200
    pc2 = jax.random.normal(k3, (B2, V2), dtype=jnp.float32)
    ctx2 = jax.random.randint(k4, (B2,), 0, V2, dtype=jnp.int32)
    loss2 = jax.block_until_ready(softmax_loss(pc2, ctx2))
    ref2 = _reference(pc2, ctx2)
    assert jnp.allclose(loss2, ref2, atol=1e-5, rtol=1e-5), (loss2, ref2)

    print("KERNEL_OK")
</pallas_src>

<mosaic_0001>
module attributes {stable_mosaic.version = 11 : i64} {
  func.func @_softmax_loss_kernel(%arg0: i32, %arg1: i32, %arg2: memref<8x1xi32, #tpu.memory_space<vmem>>, %arg3: memref<8x128xf32, #tpu.memory_space<vmem>>, %arg4: memref<8x1xf32, #tpu.memory_space<vmem>>, %arg5: memref<8x1xf32, #tpu.memory_space<vmem>>, %arg6: memref<8x1xf32, #tpu.memory_space<vmem>>, %arg7: memref<8x1xf32, #tpu.memory_space<vmem>>) attributes {dimension_semantics = [#tpu.dimension_semantics<parallel>, #tpu.dimension_semantics<arbitrary>], iteration_bounds = array<i64: 1, 1>, scalar_prefetch = 0 : i64, scratch_operands = 3 : i64, tpu.core_type = #tpu.core_type<tc>, window_params = [{transform_indices = @transform_0, window_bounds = array<i64: 8, 1>}, {transform_indices = @transform_1, window_bounds = array<i64: 8, 128>}, {transform_indices = @transform_2, window_bounds = array<i64: 8, 1>}]} {
    %c0_i32 = arith.constant 0 : i32
    %0 = arith.cmpi eq, %arg1, %c0_i32 : i32
    %1 = arith.extui %0 : i1 to i32
    %c0_i32_0 = arith.constant 0 : i32
    %2 = arith.cmpi ne, %1, %c0_i32_0 : i32
    scf.if %2 {
      %cst_24 = arith.constant 0xFF800000 : f32
      %49 = vector.broadcast %cst_24 : f32 to vector<8x1xf32>
      %c0_25 = arith.constant 0 : index
      %c0_26 = arith.constant 0 : index
      %50 = vector.load %arg5[%c0_25, %c0_26] : memref<8x1xf32, #tpu.memory_space<vmem>>, vector<8x1xf32>
      tpu.vector_store %arg5[%c0_25, %c0_26], %49 {strides = array<i32>} : memref<8x1xf32, #tpu.memory_space<vmem>>, vector<8x1xf32>,
      %cst_27 = arith.constant 0.000000e+00 : f32
      %51 = vector.broadcast %cst_27 : f32 to vector<8x1xf32>
      %c0_28 = arith.constant 0 : index
      %c0_29 = arith.constant 0 : index
      %52 = vector.load %arg6[%c0_28, %c0_29] : memref<8x1xf32, #tpu.memory_space<vmem>>, vector<8x1xf32>
      tpu.vector_store %arg6[%c0_28, %c0_29], %51 {strides = array<i32>} : memref<8x1xf32, #tpu.memory_space<vmem>>, vector<8x1xf32>,
      %cst_30 = arith.constant 0.000000e+00 : f32
      %53 = vector.broadcast %cst_30 : f32 to vector<8x1xf32>
      %c0_31 = arith.constant 0 : index
      %c0_32 = arith.constant 0 : index
      %54 = vector.load %arg7[%c0_31, %c0_32] : memref<8x1xf32, #tpu.memory_space<vmem>>, vector<8x1xf32>
      tpu.vector_store %arg7[%c0_31, %c0_32], %53 {strides = array<i32>} : memref<8x1xf32, #tpu.memory_space<vmem>>, vector<8x1xf32>,
    } else {
    }
    %c0 = arith.constant 0 : index
    %c0_1 = arith.constant 0 : index
    %3 = vector.load %arg3[%c0, %c0_1] : memref<8x128xf32, #tpu.memory_space<vmem>>, vector<8x128xf32>
    %c8_i32 = arith.constant 8 : i32
    %4 = arith.muli %arg0, %c8_i32 : i32
    %5 = tpu.iota {dimensions = array<i32: 0>} : vector<8x128xi32>
    %6 = vector.broadcast %4 : i32 to vector<8x128xi32>
    %7 = arith.addi %6, %5 : vector<8x128xi32>
    %c128_i32 = arith.constant 128 : i32
    %8 = arith.muli %arg1, %c128_i32 : i32
    %9 = tpu.iota {dimensions = array<i32: 1>} : vector<8x128xi32>
    %10 = vector.broadcast %8 : i32 to vector<8x128xi32>
    %11 = arith.addi %10, %9 : vector<8x128xi32>
    %c8_i32_2 = arith.constant 8 : i32
    %12 = vector.broadcast %c8_i32_2 : i32 to vector<8x128xi32>
    %13 = arith.cmpi slt, %7, %12 : vector<8x128xi32>
    %c128_i32_3 = arith.constant 128 : i32
    %14 = vector.broadcast %c128_i32_3 : i32 to vector<8x128xi32>
    %15 = arith.cmpi slt, %11, %14 : vector<8x128xi32>
    %16 = arith.andi %13, %15 : vector<8x128xi1>
    %cst = arith.constant 0xFF800000 : f32
    %17 = vector.broadcast %cst : f32 to vector<8x128xf32>
    %18 = arith.select %16, %3, %17 : vector<8x128xi1>, vector<8x128xf32>
    %c0_4 = arith.constant 0 : index
    %c0_5 = arith.constant 0 : index
    %19 = vector.load %arg5[%c0_4, %c0_5] : memref<8x1xf32, #tpu.memory_space<vmem>>, vector<8x1xf32>
    %cst_6 = arith.constant dense<0xFF800000> : vector<8xf32>
    %20 = vector.multi_reduction <maximumf>, %18, %cst_6 [1] : vector<8x128xf32> to vector<8xf32>
    %21 = vector.shape_cast %20 : vector<8xf32> to vector<8x1xf32>
    %22 = arith.maximumf %19, %21 : vector<8x1xf32>
    %23 = arith.subf %19, %22 : vector<8x1xf32>
    %24 = math.exp %23 : vector<8x1xf32>
    %c0_7 = arith.constant 0 : index
    %c0_8 = arith.constant 0 : index
    %25 = vector.load %arg6[%c0_7, %c0_8] : memref<8x1xf32, #tpu.memory_space<vmem>>, vector<8x1xf32>
    %26 = arith.mulf %24, %25 : vector<8x1xf32>
    %27 = vector.broadcast %22 : vector<8x1xf32> to vector<8x128xf32>
    %28 = arith.subf %18, %27 : vector<8x128xf32>
    %29 = math.exp %28 : vector<8x128xf32>
    %cst_9 = arith.constant dense<0.000000e+00> : vector<8xf32>
    %30 = vector.multi_reduction <add>, %29, %cst_9 [1] : vector<8x128xf32> to vector<8xf32>
    %31 = vector.shape_cast %30 : vector<8xf32> to vector<8x1xf32>
    %32 = arith.addf %26, %31 : vector<8x1xf32>
    %c0_10 = arith.constant 0 : index
    %c0_11 = arith.constant 0 : index
    %33 = vector.load %arg6[%c0_10, %c0_11] : memref<8x1xf32, #tpu.memory_space<vmem>>, vector<8x1xf32>
    tpu.vector_store %arg6[%c0_10, %c0_11], %32 {strides = array<i32>} : memref<8x1xf32, #tpu.memory_space<vmem>>, vector<8x1xf32>,
    %c0_12 = arith.constant 0 : index
    %c0_13 = arith.constant 0 : index
    %34 = vector.load %arg5[%c0_12, %c0_13] : memref<8x1xf32, #tpu.memory_space<vmem>>, vector<8x1xf32>
    tpu.vector_store %arg5[%c0_12, %c0_13], %22 {strides = array<i32>} : memref<8x1xf32, #tpu.memory_space<vmem>>, vector<8x1xf32>,
    %c0_14 = arith.constant 0 : index
    %c0_15 = arith.constant 0 : index
    %35 = vector.load %arg2[%c0_14, %c0_15] : memref<8x1xi32, #tpu.memory_space<vmem>>, vector<8x1xi32>
    %36 = vector.broadcast %35 : vector<8x1xi32> to vector<8x128xi32>
    %37 = arith.cmpi eq, %11, %36 : vector<8x128xi32>
    %38 = arith.andi %37, %16 : vector<8x128xi1>
    %c0_16 = arith.constant 0 : index
    %c0_17 = arith.constant 0 : index
    %39 = vector.load %arg7[%c0_16, %c0_17] : memref<8x1xf32, #tpu.memory_space<vmem>>, vector<8x1xf32>
    %cst_18 = arith.constant 0.000000e+00 : f32
    %40 = vector.broadcast %cst_18 : f32 to vector<8x128xf32>
    %41 = arith.select %38, %18, %40 : vector<8x128xi1>, vector<8x128xf32>
    %cst_19 = arith.constant dense<0.000000e+00> : vector<8xf32>
    %42 = vector.multi_reduction <add>, %41, %cst_19 [1] : vector<8x128xf32> to vector<8xf32>
    %43 = vector.shape_cast %42 : vector<8xf32> to vector<8x1xf32>
    %44 = arith.addf %39, %43 : vector<8x1xf32>
    %c0_20 = arith.constant 0 : index
    %c0_21 = arith.constant 0 : index
    %45 = vector.load %arg7[%c0_20, %c0_21] : memref<8x1xf32, #tpu.memory_space<vmem>>, vector<8x1xf32>
    tpu.vector_store %arg7[%c0_20, %c0_21], %44 {strides = array<i32>} : memref<8x1xf32, #tpu.memory_space<vmem>>, vector<8x1xf32>,
    %c0_i32_22 = arith.constant 0 : i32
    %46 = arith.cmpi eq, %arg1, %c0_i32_22 : i32
    %47 = arith.extui %46 : i1 to i32
    %c0_i32_23 = arith.constant 0 : i32
    %48 = arith.cmpi ne, %47, %c0_i32_23 : i32
    scf.if %48 {
      %c0_24 = arith.constant 0 : index
      %c0_25 = arith.constant 0 : index
      %49 = vector.load %arg6[%c0_24, %c0_25] : memref<8x1xf32, #tpu.memory_space<vmem>>, vector<8x1xf32>
      %50 = math.log %49 : vector<8x1xf32>
      %c0_26 = arith.constant 0 : index
      %c0_27 = arith.constant 0 : index
      %51 = vector.load %arg5[%c0_26, %c0_27] : memref<8x1xf32, #tpu.memory_space<vmem>>, vector<8x1xf32>
      %52 = arith.addf %50, %51 : vector<8x1xf32>
      %c0_28 = arith.constant 0 : index
      %c0_29 = arith.constant 0 : index
      %53 = vector.load %arg7[%c0_28, %c0_29] : memref<8x1xf32, #tpu.memory_space<vmem>>, vector<8x1xf32>
      %54 = arith.subf %53, %52 : vector<8x1xf32>
      %c8_i32_30 = arith.constant 8 : i32
      %55 = arith.muli %arg0, %c8_i32_30 : i32
      %56 = tpu.iota {dimensions = array<i32: 0>} : vector<8x1xi32>
      %57 = vector.broadcast %55 : i32 to vector<8x1xi32>
      %58 = arith.addi %57, %56 : vector<8x1xi32>
      %c8_i32_31 = arith.constant 8 : i32
      %59 = vector.broadcast %c8_i32_31 : i32 to vector<8x1xi32>
      %60 = arith.cmpi slt, %58, %59 : vector<8x1xi32>
      %cst_32 = arith.constant 0.000000e+00 : f32
      %61 = vector.broadcast %cst_32 : f32 to vector<8x1xf32>
      %62 = arith.select %60, %54, %61 : vector<8x1xi1>, vector<8x1xf32>
      %c0_33 = arith.constant 0 : index
      %c0_34 = arith.constant 0 : index
      %63 = vector.load %arg4[%c0_33, %c0_34] : memref<8x1xf32, #tpu.memory_space<vmem>>, vector<8x1xf32>
      tpu.vector_store %arg4[%c0_33, %c0_34], %62 {strides = array<i32>} : memref<8x1xf32, #tpu.memory_space<vmem>>, vector<8x1xf32>,
    } else {
    }
    return
  }
  func.func @transform_0(%arg0: i32, %arg1: i32) -> (i32, i32) {
    %c0_i32 = arith.constant 0 : i32
    %c0_i32_0 = arith.constant 0 : i32
    return %arg0, %c0_i32 : i32, i32
  }
  func.func @transform_1(%arg0: i32, %arg1: i32) -> (i32, i32) {
    %c0_i32 = arith.constant 0 : i32
    return %arg0, %arg1 : i32, i32
  }
  func.func @transform_2(%arg0: i32, %arg1: i32) -> (i32, i32) {
    %c0_i32 = arith.constant 0 : i32
    %c0_i32_0 = arith.constant 0 : i32
    return %arg0, %c0_i32 : i32, i32
  }
}

</mosaic_0001>

<bundles_post_ra>
// kernel: softmax_loss.1
= control target key start
LH: loop header
LB: loop body
LE: loop exit
PB: predicated region body
PF: predicated region fallthrough
CT: control target
= control target key end

     0   :  { %vm15_vm0 = vcmask 7168   ;;  %v96_v1 = vmov -inf   ;;  %v97_v2 = vmov 0   ;;  %v98_v3 = vmov 0.0   ;;  %s130_s1 = inlined_call_operand.vmem [shape: f32[8,128], index: 1, kind: input, shape index: {}]   ;;  %s131_s0 = inlined_call_operand.vmem [shape: s32[8,1], index: 0, kind: input, shape index: {}]   ;;  %s132_s2 = inlined_call_operand.vmem [shape: f32[8,1], index: 2, kind: output, shape index: {}]  }
   0x1   :  { %v19_v0 = vld [vmem:[%s130_s1] sm:$0xff]  ;;  %16 = vst.msk [vmem:[#allocation2] sm:$0xff] %vm15_vm0, %v96_v1  ;;  %88 = vset.pattern.permute.xlu0 %v97_v2  ;;  %89 = vset.pattern.permute.xlu1 %v97_v2  ;;  %v26_v9 = vlaneseq }
   0x2   :  { %35 = vmax.xlane.f32.xlu0 %v19_v0  ;;  %17 = vst.msk [vmem:[#allocation3] sm:$0xff] %vm15_vm0, %v98_v3  ;;  %v57_v4 = vld [vmem:[%s131_s0] sm:$0xff] }
   0x3   :  { %18 = vst.msk [vmem:[#allocation4] sm:$0xff] %vm15_vm0, %v98_v3  ;;  %59 = vperm.xlu1 %89, %v57_v4   ;;  %v27_v11 = vand.u32 127, %v26_v9 }
   0x8   :  { %v34_v5 = vld [vmem:[#allocation2] sm:$0xff] }
   0x9   :  { %v41_v22 = vld [vmem:[#allocation3] sm:$0xff] }
   0xa   :  { %v63_v17 = vld [vmem:[#allocation4] sm:$0xff] }
  0x75   :  { %v36_v6 = vpop.xlane.xlu0 %35  ;;  %v60_v10 = vpop.permute.xlu1 %59 }
  0x76   :  { %v37_v7 = vmax.f32 %v34_v5, %v36_v6  ;;  %vm61_vm1 = vcmp.eq.s32.totalorder %v27_v11, %v60_v10 }
  0x77   :  { %v64_v12 = vsel %vm61_vm1, %v19_v0, 0.0 }
  0x78   :  { %v38_v8 = vsub.f32 %v34_v5, %v37_v7  ;;  %56 = vst.msk [vmem:[#allocation2] sm:$0xff] %vm15_vm0, %v37_v7  ;;  %45 = vperm.xlu0 %88, %v37_v7   ;;  %65 = vadd.xlane.f32.xlu2 %v64_v12 }
  0x7a   :  { %v39_v20 = vmul.f32 1.442695, %v38_v8 }
  0x7f   :  { %v75_v29 = vld [vmem:[#allocation2] sm:$0xff] }
  0xea   :  { %v46_v13 = vpop.permute.xlu0 %45 }
  0xeb   :  { %v48_v14 = vsub.f32 %v19_v0, %v46_v13  ;;  %v66_v18 = vpop.xlane.xlu2 %65 }
  0xec   :  { %v67_v19 = vadd.f32 %v66_v18, %v63_v17 }
  0xed   :  { %v49_v15 = vmul.f32 1.442695, %v48_v14 }
  0xee   :  { %68 = vst.msk [vmem:[#allocation4] sm:$0xff] %vm15_vm0, %v67_v19 }
  0xef   :  { %90 = vpow2.f32 %v49_v15 }
  0xf0   :  { %92 = vpow2.f32 %v39_v20 }
  0xf5   :  { %v91_v16 = vpop.eup %90  ;;  %v77_v30 = vld [vmem:[#allocation4] sm:$0xff] }
  0xf6   :  { %51 = vadd.xlane.f32.xlu1 %v91_v16  ;;  %v93_v21 = vpop.eup %92 }
  0xf7   :  { %v42_v23 = vmul.f32 %v93_v21, %v41_v22 }
 0x169   :  { %v52_v24 = vpop.xlane.xlu1 %51 }
 0x16a   :  { %v53_v25 = vadd.f32 %v52_v24, %v42_v23 }
 0x16c   :  { %55 = vst.msk [vmem:[#allocation3] sm:$0xff] %vm15_vm0, %v53_v25 }
 0x173   :  { %v72_v26 = vld [vmem:[#allocation3] sm:$0xff] }
 0x174   :  { %94 = vlog2.f32 %v72_v26 }
 0x17a   :  { %v95_v27 = vpop.eup %94 }
 0x17b   :  { %v74_v28 = vmul.f32 0.6931472, %v95_v27 }
 0x17d   :  { %v76_v31 = vadd.f32 %v75_v29, %v74_v28 }
 0x17f   :  { %v78_v32 = vsub.f32 %v77_v30, %v76_v31 }
 0x181   :  { %80 = vst.msk [vmem:[%s132_s2] sm:$0xff] %vm15_vm0, %v78_v32 }

</bundles_post_ra>
